<compile_context>
chip_gen: v6e
topology: v6e:2x2x1
jax: 0.10.0
libtpu: 0.0.40
codegen_flags: <defaults>
</compile_context>

<pallas_src>
import functools

import jax
import jax.numpy as jnp
from jax import lax
from jax.experimental import pallas as pl
from jax.experimental.pallas import tpu as pltpu


def _ce_kernel(logits_ref, labels_ref, out_ref,
               m_scr, l_scr, ysum_scr, yx_scr,
               *, n_rows, n_classes, mask_cols):
    """Online soft-label CE over (row-tile, class-chunk) grid.

    Writes one f32 partial sum (over the rows of this tile) per row tile.
    """
    i = pl.program_id(0)           # row-tile index   ("parallel")
    c = pl.program_id(1)           # class-chunk index ("arbitrary", last)
    nc = pl.num_programs(1)
    tile_rows, tile_c = logits_ref.shape

    @pl.when(c == 0)
    def _():
        m_scr[...] = jnp.full_like(m_scr, -jnp.inf)
        l_scr[...] = jnp.zeros_like(l_scr)
        ysum_scr[...] = jnp.zeros_like(ysum_scr)
        yx_scr[...] = jnp.zeros_like(yx_scr)

    x = logits_ref[...].astype(jnp.float32)   # (tile_rows, tile_c) f32 compute
    y = labels_ref[...]                       # keep input dtype; promotes in products

    if mask_cols:
        # Ragged last class chunk: out-of-bounds columns hold garbage.
        col = lax.broadcasted_iota(jnp.int32, (tile_rows, tile_c), 1) + c * tile_c
        col_ok = col < n_classes
        x_neg = jnp.where(col_ok, x, -jnp.inf)   # for max / exp (exp(-inf)=0)
        x_zero = jnp.where(col_ok, x, 0.0)       # for the y*x sum
        y_zero = jnp.where(col_ok, y, jnp.zeros_like(y))
    else:
        x_neg, x_zero, y_zero = x, x, y

    # Online max / log-sum-exp carry.
    m_prev = m_scr[...]
    m_new = jnp.maximum(m_prev, jnp.max(x_neg, axis=-1, keepdims=True))
    l_scr[...] = (l_scr[...] * jnp.exp(m_prev - m_new)
                  + jnp.sum(jnp.exp(x_neg - m_new), axis=-1, keepdims=True))
    m_scr[...] = m_new

    # Running sum(y) and sum(y * x) (both accumulate in f32).
    ysum_scr[...] += jnp.sum(y_zero, axis=-1, keepdims=True, dtype=jnp.float32)
    yx_scr[...] += jnp.sum(y_zero * x_zero, axis=-1, keepdims=True)

    @pl.when(c == nc - 1)
    def _():
        # loss_row = (m + log(l)) * sum(y) - sum(y * x)
        lse = m_scr[...] + jnp.log(l_scr[...])
        loss_rows = lse * ysum_scr[...] - yx_scr[...]          # (tile_rows, 1)
        # Mask ragged tail rows (garbage / possibly NaN logits -> forced to 0).
        row = lax.broadcasted_iota(jnp.int32, (tile_rows, 1), 0) + i * tile_rows
        loss_rows = jnp.where(row < n_rows, loss_rows, 0.0)
        out_ref[0, 0] = jnp.sum(loss_rows)                     # scalar -> SMEM


def _pick_tiles(n_rows, n_classes, itemsize):
    """Tile sizes targeting ~2 MiB per-input DMA blocks and >= ~8 grid steps."""
    row_align = 16                   # sublane packing: f32 needs 8, bf16 needs 16
    max_tile_c = 4096                # class-chunk cap (multiple of 128) for vocab-scale C
    block_budget = 2 * 1024 * 1024   # ~85% of HBM roofline is reached by ~1-2 MiB blocks

    tile_c = n_classes if n_classes <= max_tile_c else max_tile_c

    tile_rows = block_budget // max(tile_c * itemsize, 1)
    tile_rows = max(row_align, min(tile_rows, 2048))
    tile_rows = (tile_rows // row_align) * row_align
    # Keep >= ~8 row-tile steps when N allows: hides prologue/epilogue DMA and
    # gives both v7x TensorCores work instead of collapsing to 1-2 huge steps.
    row_target = ((pl.cdiv(n_rows, 8) + row_align - 1) // row_align) * row_align
    tile_rows = min(tile_rows, max(row_align, row_target))
    return tile_rows, tile_c


def cross_entropy_with_logits(logits, labels, *, tile_rows=None, tile_classes=None):
    """Pallas implementation of CrossEntropyWithLogits.forward (reduction='mean').

    logits, labels: same shape (..., C). Returns a float32 scalar.
    """
    assert logits.shape == labels.shape, (logits.shape, labels.shape)
    C = int(logits.shape[-1])
    N = 1
    for d in logits.shape[:-1]:
        N *= int(d)
    logits2 = logits.reshape(N, C)
    labels2 = labels.reshape(N, C)

    itemsize = max(jnp.dtype(logits2.dtype).itemsize, jnp.dtype(labels2.dtype).itemsize)
    tr, tc = _pick_tiles(N, C, itemsize)
    if tile_rows is not None:
        tr = int(tile_rows)
    if tile_classes is not None:
        tc = int(tile_classes)

    num_row_tiles = pl.cdiv(N, tr)
    num_class_chunks = pl.cdiv(C, tc)
    grid = (num_row_tiles, num_class_chunks)

    # VMEM sizing: 2 inputs x 2 pipeline buffers at input dtype, ~3 live f32
    # (tr, tc) temporaries inside the kernel, (tr, 1) f32 scratch (lane-padded
    # to 128) and headroom.  Clamped to [32 MiB, 48 MiB]: above v5e's 16 MiB
    # default scoped VMEM, comfortably inside v7x's 64 MiB physical VMEM.
    in_bytes = 2 * 2 * tr * tc * itemsize
    tmp_bytes = 3 * tr * tc * 4
    scr_bytes = 4 * tr * 128 * 4
    vmem_limit = int(min(max(in_bytes + tmp_bytes + scr_bytes + (8 << 20), 32 << 20),
                         48 << 20))

    cost = pl.CostEstimate(
        flops=int(6 * N * C),
        transcendentals=int(N * C),
        bytes_accessed=int(2 * N * C * itemsize + num_row_tiles * 4),
    )

    kernel = functools.partial(
        _ce_kernel,
        n_rows=N,
        n_classes=C,
        mask_cols=(num_class_chunks * tc != C),   # only the ragged last chunk needs it
    )

    partials = pl.pallas_call(
        kernel,
        out_shape=jax.ShapeDtypeStruct((num_row_tiles, 1), jnp.float32),
        grid_spec=pltpu.PrefetchScalarGridSpec(
            num_scalar_prefetch=0,
            grid=grid,
            in_specs=[
                pl.BlockSpec((tr, tc), lambda i, c: (i, c)),
                pl.BlockSpec((tr, tc), lambda i, c: (i, c)),
            ],
            # One f32 partial per row tile, written on the last class chunk.
            out_specs=pl.BlockSpec((1, 1), lambda i, c: (i, 0),
                                   memory_space=pltpu.MemorySpace.SMEM),
            scratch_shapes=[pltpu.VMEM((tr, 1), jnp.float32)] * 4,
        ),
        compiler_params=pltpu.CompilerParams(
            # Row-tile axis has no cross-step state -> truly parallel (shards
            # across both TensorCores on v7x; measured no-op on v5e/v6e).
            # Class-chunk axis carries the online-LSE scratch -> arbitrary.
            dimension_semantics=("parallel", "arbitrary"),
            vmem_limit_bytes=vmem_limit,
        ),
        cost_estimate=cost,
    )(logits2, labels2)

    # Tiny final reduction over num_row_tiles partials; masked rows contribute 0.
    return jnp.sum(partials) / jnp.float32(N)


def _reference(logits, labels):
    log_prob = jax.nn.log_softmax(logits.astype(jnp.float32), axis=-1)
    return jnp.mean(jnp.sum(-labels.astype(jnp.float32) * log_prob, axis=-1))


if __name__ == "__main__":
    key = jax.random.PRNGKey(0)
    k1, k2 = jax.random.split(key)

    # Case 1: small aligned shapes (batch=2, seq=8, classes=128).
    B, S, C = 2, 8, 128
    logits = jax.random.normal(k1, (B, S, C), dtype=jnp.float32)
    labels = jax.nn.softmax(jax.random.normal(k2, (B, S, C), dtype=jnp.float32), axis=-1)
    loss = jax.block_until_ready(cross_entropy_with_logits(logits, labels))
    ref = _reference(logits, labels)
    assert jnp.allclose(loss, ref, rtol=1e-5, atol=1e-5), (loss, ref)

    # Case 2: rows not a multiple of the tile and classes not a multiple of 128
    # (exercises the in-kernel tail-row mask; no wrapper-side padding copy).
    B2, S2, C2 = 3, 7, 96
    logits_b = jax.random.normal(k1, (B2, S2, C2), dtype=jnp.float32)
    labels_b = jax.nn.softmax(jax.random.normal(k2, (B2, S2, C2), dtype=jnp.float32), axis=-1)
    loss_b = jax.block_until_ready(cross_entropy_with_logits(logits_b, labels_b))
    ref_b = _reference(logits_b, labels_b)
    assert jnp.allclose(loss_b, ref_b, rtol=1e-5, atol=1e-5), (loss_b, ref_b)

    # Case 3: force the class-axis online-LSE split with a ragged last chunk,
    # bf16 inputs (exercises column masking + mixed-dtype promotion).
    B3, S3, C3 = 2, 8, 192
    logits_c = jax.random.normal(k1, (B3, S3, C3), dtype=jnp.float32).astype(jnp.bfloat16)
    labels_c = jax.nn.softmax(
        jax.random.normal(k2, (B3, S3, C3), dtype=jnp.float32), axis=-1).astype(jnp.bfloat16)
    loss_c = jax.block_until_ready(
        cross_entropy_with_logits(logits_c, labels_c, tile_classes=128))
    ref_c = _reference(logits_c, labels_c)
    assert jnp.allclose(loss_c, ref_c, rtol=1e-2, atol=1e-2), (loss_c, ref_c)

    print("KERNEL_OK")
</pallas_src>

<mosaic_0001>
module attributes {stable_mosaic.version = 11 : i64} {
  func.func @_ce_kernel(%arg0: i32, %arg1: i32, %arg2: memref<16x128xf32, #tpu.memory_space<vmem>>, %arg3: memref<16x128xf32, #tpu.memory_space<vmem>>, %arg4: memref<1x1xf32, #tpu.memory_space<smem>>, %arg5: memref<16x1xf32, #tpu.memory_space<vmem>>, %arg6: memref<16x1xf32, #tpu.memory_space<vmem>>, %arg7: memref<16x1xf32, #tpu.memory_space<vmem>>, %arg8: memref<16x1xf32, #tpu.memory_space<vmem>>) attributes {dimension_semantics = [#tpu.dimension_semantics<parallel>, #tpu.dimension_semantics<arbitrary>], iteration_bounds = array<i64: 1, 1>, scalar_prefetch = 0 : i64, scratch_operands = 4 : i64, tpu.core_type = #tpu.core_type<tc>, window_params = [{transform_indices = @transform_0, window_bounds = array<i64: 16, 128>}, {transform_indices = @transform_1, window_bounds = array<i64: 16, 128>}, {transform_indices = @transform_2, window_bounds = array<i64: 1, 1>}]} {
    %c0_i32 = arith.constant 0 : i32
    %0 = arith.cmpi eq, %arg1, %c0_i32 : i32
    %1 = arith.extui %0 : i1 to i32
    %c0_i32_0 = arith.constant 0 : i32
    %2 = arith.cmpi ne, %1, %c0_i32_0 : i32
    scf.if %2 {
      %cst_25 = arith.constant 0xFF800000 : f32
      %35 = vector.broadcast %cst_25 : f32 to vector<16x1xf32>
      %c0_26 = arith.constant 0 : index
      %c0_27 = arith.constant 0 : index
      %36 = vector.load %arg5[%c0_26, %c0_27] : memref<16x1xf32, #tpu.memory_space<vmem>>, vector<16x1xf32>
      tpu.vector_store %arg5[%c0_26, %c0_27], %35 {strides = array<i32>} : memref<16x1xf32, #tpu.memory_space<vmem>>, vector<16x1xf32>,
      %cst_28 = arith.constant 0.000000e+00 : f32
      %37 = vector.broadcast %cst_28 : f32 to vector<16x1xf32>
      %c0_29 = arith.constant 0 : index
      %c0_30 = arith.constant 0 : index
      %38 = vector.load %arg6[%c0_29, %c0_30] : memref<16x1xf32, #tpu.memory_space<vmem>>, vector<16x1xf32>
      tpu.vector_store %arg6[%c0_29, %c0_30], %37 {strides = array<i32>} : memref<16x1xf32, #tpu.memory_space<vmem>>, vector<16x1xf32>,
      %cst_31 = arith.constant 0.000000e+00 : f32
      %39 = vector.broadcast %cst_31 : f32 to vector<16x1xf32>
      %c0_32 = arith.constant 0 : index
      %c0_33 = arith.constant 0 : index
      %40 = vector.load %arg7[%c0_32, %c0_33] : memref<16x1xf32, #tpu.memory_space<vmem>>, vector<16x1xf32>
      tpu.vector_store %arg7[%c0_32, %c0_33], %39 {strides = array<i32>} : memref<16x1xf32, #tpu.memory_space<vmem>>, vector<16x1xf32>,
      %cst_34 = arith.constant 0.000000e+00 : f32
      %41 = vector.broadcast %cst_34 : f32 to vector<16x1xf32>
      %c0_35 = arith.constant 0 : index
      %c0_36 = arith.constant 0 : index
      %42 = vector.load %arg8[%c0_35, %c0_36] : memref<16x1xf32, #tpu.memory_space<vmem>>, vector<16x1xf32>
      tpu.vector_store %arg8[%c0_35, %c0_36], %41 {strides = array<i32>} : memref<16x1xf32, #tpu.memory_space<vmem>>, vector<16x1xf32>,
    } else {
    }
    %c0 = arith.constant 0 : index
    %c0_1 = arith.constant 0 : index
    %3 = vector.load %arg2[%c0, %c0_1] : memref<16x128xf32, #tpu.memory_space<vmem>>, vector<16x128xf32>
    %c0_2 = arith.constant 0 : index
    %c0_3 = arith.constant 0 : index
    %4 = vector.load %arg3[%c0_2, %c0_3] : memref<16x128xf32, #tpu.memory_space<vmem>>, vector<16x128xf32>
    %c0_4 = arith.constant 0 : index
    %c0_5 = arith.constant 0 : index
    %5 = vector.load %arg5[%c0_4, %c0_5] : memref<16x1xf32, #tpu.memory_space<vmem>>, vector<16x1xf32>
    %cst = arith.constant dense<0xFF800000> : vector<16xf32>
    %6 = vector.multi_reduction <maximumf>, %3, %cst [1] : vector<16x128xf32> to vector<16xf32>
    %7 = vector.shape_cast %6 : vector<16xf32> to vector<16x1xf32>
    %8 = arith.maximumf %5, %7 : vector<16x1xf32>
    %c0_6 = arith.constant 0 : index
    %c0_7 = arith.constant 0 : index
    %9 = vector.load %arg6[%c0_6, %c0_7] : memref<16x1xf32, #tpu.memory_space<vmem>>, vector<16x1xf32>
    %10 = arith.subf %5, %8 : vector<16x1xf32>
    %11 = math.exp %10 : vector<16x1xf32>
    %12 = arith.mulf %9, %11 : vector<16x1xf32>
    %13 = vector.broadcast %8 : vector<16x1xf32> to vector<16x128xf32>
    %14 = arith.subf %3, %13 : vector<16x128xf32>
    %15 = math.exp %14 : vector<16x128xf32>
    %cst_8 = arith.constant dense<0.000000e+00> : vector<16xf32>
    %16 = vector.multi_reduction <add>, %15, %cst_8 [1] : vector<16x128xf32> to vector<16xf32>
    %17 = vector.shape_cast %16 : vector<16xf32> to vector<16x1xf32>
    %18 = arith.addf %12, %17 : vector<16x1xf32>
    %c0_9 = arith.constant 0 : index
    %c0_10 = arith.constant 0 : index
    %19 = vector.load %arg6[%c0_9, %c0_10] : memref<16x1xf32, #tpu.memory_space<vmem>>, vector<16x1xf32>
    tpu.vector_store %arg6[%c0_9, %c0_10], %18 {strides = array<i32>} : memref<16x1xf32, #tpu.memory_space<vmem>>, vector<16x1xf32>,
    %c0_11 = arith.constant 0 : index
    %c0_12 = arith.constant 0 : index
    %20 = vector.load %arg5[%c0_11, %c0_12] : memref<16x1xf32, #tpu.memory_space<vmem>>, vector<16x1xf32>
    tpu.vector_store %arg5[%c0_11, %c0_12], %8 {strides = array<i32>} : memref<16x1xf32, #tpu.memory_space<vmem>>, vector<16x1xf32>,
    %c0_13 = arith.constant 0 : index
    %c0_14 = arith.constant 0 : index
    %21 = vector.load %arg7[%c0_13, %c0_14] : memref<16x1xf32, #tpu.memory_space<vmem>>, vector<16x1xf32>
    %cst_15 = arith.constant dense<0.000000e+00> : vector<16xf32>
    %22 = vector.multi_reduction <add>, %4, %cst_15 [1] : vector<16x128xf32> to vector<16xf32>
    %23 = vector.shape_cast %22 : vector<16xf32> to vector<16x1xf32>
    %24 = arith.addf %21, %23 : vector<16x1xf32>
    %c0_16 = arith.constant 0 : index
    %c0_17 = arith.constant 0 : index
    %25 = vector.load %arg7[%c0_16, %c0_17] : memref<16x1xf32, #tpu.memory_space<vmem>>, vector<16x1xf32>
    tpu.vector_store %arg7[%c0_16, %c0_17], %24 {strides = array<i32>} : memref<16x1xf32, #tpu.memory_space<vmem>>, vector<16x1xf32>,
    %c0_18 = arith.constant 0 : index
    %c0_19 = arith.constant 0 : index
    %26 = vector.load %arg8[%c0_18, %c0_19] : memref<16x1xf32, #tpu.memory_space<vmem>>, vector<16x1xf32>
    %27 = arith.mulf %4, %3 : vector<16x128xf32>
    %cst_20 = arith.constant dense<0.000000e+00> : vector<16xf32>
    %28 = vector.multi_reduction <add>, %27, %cst_20 [1] : vector<16x128xf32> to vector<16xf32>
    %29 = vector.shape_cast %28 : vector<16xf32> to vector<16x1xf32>
    %30 = arith.addf %26, %29 : vector<16x1xf32>
    %c0_21 = arith.constant 0 : index
    %c0_22 = arith.constant 0 : index
    %31 = vector.load %arg8[%c0_21, %c0_22] : memref<16x1xf32, #tpu.memory_space<vmem>>, vector<16x1xf32>
    tpu.vector_store %arg8[%c0_21, %c0_22], %30 {strides = array<i32>} : memref<16x1xf32, #tpu.memory_space<vmem>>, vector<16x1xf32>,
    %c0_i32_23 = arith.constant 0 : i32
    %32 = arith.cmpi eq, %arg1, %c0_i32_23 : i32
    %33 = arith.extui %32 : i1 to i32
    %c0_i32_24 = arith.constant 0 : i32
    %34 = arith.cmpi ne, %33, %c0_i32_24 : i32
    scf.if %34 {
      %c0_25 = arith.constant 0 : index
      %c0_26 = arith.constant 0 : index
      %35 = vector.load %arg5[%c0_25, %c0_26] : memref<16x1xf32, #tpu.memory_space<vmem>>, vector<16x1xf32>
      %c0_27 = arith.constant 0 : index
      %c0_28 = arith.constant 0 : index
      %36 = vector.load %arg6[%c0_27, %c0_28] : memref<16x1xf32, #tpu.memory_space<vmem>>, vector<16x1xf32>
      %37 = math.log %36 : vector<16x1xf32>
      %38 = arith.addf %35, %37 : vector<16x1xf32>
      %c0_29 = arith.constant 0 : index
      %c0_30 = arith.constant 0 : index
      %39 = vector.load %arg7[%c0_29, %c0_30] : memref<16x1xf32, #tpu.memory_space<vmem>>, vector<16x1xf32>
      %40 = arith.mulf %38, %39 : vector<16x1xf32>
      %c0_31 = arith.constant 0 : index
      %c0_32 = arith.constant 0 : index
      %41 = vector.load %arg8[%c0_31, %c0_32] : memref<16x1xf32, #tpu.memory_space<vmem>>, vector<16x1xf32>
      %42 = arith.subf %40, %41 : vector<16x1xf32>
      %43 = tpu.iota {dimensions = array<i32: 0>} : vector<16x1xi32>
      %c16_i32 = arith.constant 16 : i32
      %44 = arith.muli %arg0, %c16_i32 : i32
      %45 = vector.broadcast %44 : i32 to vector<16x1xi32>
      %46 = arith.addi %43, %45 : vector<16x1xi32>
      %c16_i32_33 = arith.constant 16 : i32
      %47 = vector.broadcast %c16_i32_33 : i32 to vector<16x1xi32>
      %48 = arith.cmpi slt, %46, %47 : vector<16x1xi32>
      %cst_34 = arith.constant 0.000000e+00 : f32
      %49 = vector.broadcast %cst_34 : f32 to vector<16x1xf32>
      %50 = arith.select %48, %42, %49 : vector<16x1xi1>, vector<16x1xf32>
      %51 = vector.shape_cast %50 : vector<16x1xf32> to vector<1x16x1xf32>
      %cst_35 = arith.constant dense<0.000000e+00> : vector<1xf32>
      %52 = vector.multi_reduction <add>, %51, %cst_35 [1, 2] : vector<1x16x1xf32> to vector<1xf32>
      %53 = vector.shape_cast %52 : vector<1xf32> to vector<1x1x1xf32>
      %54 = vector.extract %53[0, 0, 0] : f32 from vector<1x1x1xf32>
      %c0_36 = arith.constant 0 : index
      %c0_37 = arith.constant 0 : index
      %55 = memref.load %arg4[%c0_36, %c0_37] : memref<1x1xf32, #tpu.memory_space<smem>>
      memref.store %54, %arg4[%c0_36, %c0_37] : memref<1x1xf32, #tpu.memory_space<smem>>
    } else {
    }
    return
  }
  func.func @transform_0(%arg0: i32, %arg1: i32) -> (i32, i32) {
    %c0_i32 = arith.constant 0 : i32
    return %arg0, %arg1 : i32, i32
  }
  func.func @transform_1(%arg0: i32, %arg1: i32) -> (i32, i32) {
    %c0_i32 = arith.constant 0 : i32
    return %arg0, %arg1 : i32, i32
  }
  func.func @transform_2(%arg0: i32, %arg1: i32) -> (i32, i32) {
    %c0_i32 = arith.constant 0 : i32
    %c0_i32_0 = arith.constant 0 : i32
    return %arg0, %c0_i32 : i32, i32
  }
}

</mosaic_0001>

<bundles_post_ra>
// kernel: tpu_custom_call.1
= control target key start
LH: loop header
LB: loop body
LE: loop exit
PB: predicated region body
PF: predicated region fallthrough
CT: control target
= control target key end

     0   :  { %7 = vsyncpa [#allocation7], 0  ;;  %s313_s0 = inlined_call_operand.hbm [shape: f32[16,128], index: 0, kind: input, shape index: {}]   ;;  %s314_s1 = inlined_call_operand.hbm [shape: f32[16,128], index: 1, kind: input, shape index: {}]   ;;  %s315_s2 = inlined_call_operand.hbm [shape: f32[1,1], index: 2, kind: output, shape index: {}]  }
   0x1   :  { %8 = vsyncpa [#allocation10], 0 }
   0x2   :  { %9 = vsyncpa [#allocation8], 0  ;;  %s263_s9 = smov [#allocation6]  }
   0x3   :  { %s15_s10 = sshll.u32 %s263_s9, 4  ;;  %s16_s10 = int_to_ptr.vmem [resolvable:$true] %s15_s10 }
   0x4   :  { %s217_s11 = scalar_lea.vmem %s16_s10, 256  ;;  %p222_p1 = scmp.lt.s32.totalorder %s16_s10, %s16_s10 }
   0x5   :  { %p218_p0 = scmp.ne.s32.totalorder %s16_s10, %s217_s11  ;;  %p223_p2 = scmp.lt.s32.totalorder %s217_s11, %s217_s11 }
   0x7   :  { %p224_p3 = por %p223_p2, %p222_p1 }
   0x9   :  { %p225_p4 = pnand %p224_p3, %p218_p0 }
   0xb   :  { %228 = shalt.err (!%p225_p4)
}
   0xc   :  { %s264_s12 = smov 128   ;;  %s265_s13 = smov 8  }
   0xd   :  { %21 = dma.hbm_to_vmem [thread:$0]  %s313_s0, 256, %s16_s10, [#allocation7], %s264_s12, %s264_s12, %s265_s13  }
   0xe   :  { %s266_s16 = smov [#allocation9]  }
   0xf   :  { %s27_s17 = sshll.u32 %s266_s16, 4  ;;  %s28_s17 = int_to_ptr.vmem [resolvable:$true] %s27_s17 }
  0x10   :  { %s237_s18 = scalar_lea.vmem %s28_s17, 256  ;;  %p242_p6 = scmp.lt.s32.totalorder %s28_s17, %s28_s17 }
  0x11   :  { %p238_p5 = scmp.ne.s32.totalorder %s28_s17, %s237_s18  ;;  %p243_p7 = scmp.lt.s32.totalorder %s237_s18, %s237_s18 }
  0x13   :  { %p244_p8 = por %p243_p7, %p242_p6 }
  0x15   :  { %p245_p9 = pnand %p244_p8, %p238_p5 }
  0x17   :  { %248 = shalt.err (!%p245_p9)
}
  0x18   :  { %33 = dma.hbm_to_vmem [thread:$0]  %s314_s1, 256, %s28_s17, [#allocation10], %s264_s12, %s264_s12, %s265_s13  }
  0x19   :  { %257 = dma.done.wait [#allocation7], 256  }
  0x1a   :  { %258 = vsyncadd [#allocation7], 4294967040 }
  0x1b   :  { %259 = dma.done.wait [#allocation10], 256  }
  0x1c   :  { %260 = vsyncadd [#allocation10], 4294967040  ;;  %vm44_vm0 = vcmask 7168   ;;  %v267_v0 = vmov -inf   ;;  %v53_v1 = vld [vmem:[#allocation6] sm:$0xff]  ;;  %v54_v2 = vld [vmem:[#allocation6 + $0x8] sm:$0xff] }
  0x1d   :  { %45 = vst.msk [vmem:[#allocation2] sm:$0xff] %vm44_vm0, %v267_v0  ;;  %46 = vst.msk [vmem:[#allocation2 + $0x8] sm:$0xff] %vm44_vm0, %v267_v0  ;;  %59 = vmax.xlane.f32.xlu0 %v53_v1  ;;  %v268_v3 = vmov 0   ;;  %v269_v4 = vmov 0.0   ;;  %v55_v20 = vld [vmem:[#allocation9] sm:$0xff]  ;;  %v56_v22 = vld [vmem:[#allocation9 + $0x8] sm:$0xff] }
  0x1e   :  { %195 = vset.pattern.permute.xlu1 %v268_v3  ;;  %196 = vset.pattern.permute.xlu0 %v268_v3  ;;  %47 = vst.msk [vmem:[#allocation3] sm:$0xff] %vm44_vm0, %v269_v4  ;;  %48 = vst.msk [vmem:[#allocation3 + $0x8] sm:$0xff] %vm44_vm0, %v269_v4  ;;  %v114_v23 = vmul.f32 %v55_v20, %v53_v1  ;;  %v115_v24 = vmul.f32 %v56_v22, %v54_v2  ;;  %s270_s1 = smov [#allocation11]  }
  0x1f   :  { %49 = vst.msk [vmem:[#allocation4] sm:$0xff] %vm44_vm0, %v269_v4  ;;  %50 = vst.msk [vmem:[#allocation4 + $0x8] sm:$0xff] %vm44_vm0, %v269_v4 }
  0x20   :  { %51 = vst.msk [vmem:[#allocation5] sm:$0xff] %vm44_vm0, %v269_v4  ;;  %52 = vst.msk [vmem:[#allocation5 + $0x8] sm:$0xff] %vm44_vm0, %v269_v4 }
  0x21   :  { %61 = vmax.xlane.f32.xlu0 %v54_v2 }
  0x24   :  { %v57_v5 = vld [vmem:[#allocation2] sm:$0xff]  ;;  %v58_v8 = vld [vmem:[#allocation2 + $0x8] sm:$0xff] }
  0x25   :  { %v65_v28 = vld [vmem:[#allocation3] sm:$0xff]  ;;  %v66_v32 = vld [vmem:[#allocation3 + $0x8] sm:$0xff] }
  0x26   :  { %v102_v34 = vld [vmem:[#allocation4] sm:$0xff]  ;;  %v103_v40 = vld [vmem:[#allocation4 + $0x8] sm:$0xff] }
  0x27   :  { %v112_v43 = vld [vmem:[#allocation5] sm:$0xff]  ;;  %v113_v47 = vld [vmem:[#allocation5 + $0x8] sm:$0xff] }
  0xa6   :  { %v60_v6 = vpop.xlane.xlu0 %59 }
  0xa7   :  { %v63_v7 = vmax.f32 %v57_v5, %v60_v6 }
  0xa9   :  { %v67_v9 = vsub.f32 %v57_v5, %v63_v7  ;;  %100 = vst.msk [vmem:[#allocation2] sm:$0xff] %vm44_vm0, %v63_v7  ;;  %77 = vperm.xlu1 %195, %v63_v7  }
  0xaa   :  { %v62_v10 = vpop.xlane.xlu0 %61 }
  0xab   :  { %v64_v11 = vmax.f32 %v58_v8, %v62_v10  ;;  %v69_v25 = vmul.f32 1.442695, %v67_v9 }
  0xad   :  { %v68_v12 = vsub.f32 %v58_v8, %v64_v11  ;;  %101 = vst.msk [vmem:[#allocation2 + $0x8] sm:$0xff] %vm44_vm0, %v64_v11  ;;  %82 = vperm.xlu1 %195, %v64_v11  }
  0xaf   :  { %v71_v26 = vmul.f32 1.442695, %v68_v12 }
  0xb0   :  { %v127_v53 = vld [vmem:[#allocation2] sm:$0xff] }
  0xb4   :  { %v128_v59 = vld [vmem:[#allocation2 + $0x8] sm:$0xff] }
 0x124   :  { %v78_v13 = vpop.permute.xlu1 %77 }
 0x125   :  { %v85_v14 = vsub.f32 %v53_v1, %v78_v13 }
 0x127   :  { %v87_v15 = vmul.f32 1.442695, %v85_v14 }
 0x128   :  { %v83_v16 = vpop.permute.xlu1 %82 }
 0x129   :  { %197 = vpow2.f32 %v87_v15  ;;  %v86_v17 = vsub.f32 %v54_v2, %v83_v16 }
 0x12b   :  { %v89_v18 = vmul.f32 1.442695, %v86_v17 }
 0x12d   :  { %199 = vpow2.f32 %v89_v18 }
 0x12e   :  { %201 = vpow2.f32 %v69_v25 }
 0x12f   :  { %203 = vpow2.f32 %v71_v26 }
 0x136   :  { %v198_v19 = vpop.eup %197 }
 0x137   :  { %91 = vadd.xlane.f32.xlu0 %v198_v19 }
 0x13a   :  { %v200_v21 = vpop.eup %199 }
 0x13b   :  { %93 = vadd.xlane.f32.xlu1 %v200_v21  ;;  %104 = vadd.xlane.f32.xlu0 %v55_v20  ;;  %v202_v27 = vpop.eup %201 }
 0x13c   :  { %v73_v29 = vmul.f32 %v202_v27, %v65_v28  ;;  %v204_v30 = vpop.eup %203 }
 0x13d   :  { %v74_v35 = vmul.f32 %v204_v30, %v66_v32 }
 0x13f   :  { %106 = vadd.xlane.f32.xlu0 %v56_v22 }
 0x143   :  { %116 = vadd.xlane.f32.xlu0 %v114_v23 }
 0x147   :  { %118 = vadd.xlane.f32.xlu0 %v115_v24 }
 0x1c0   :  { %v92_v31 = vpop.xlane.xlu0 %91 }
 0x1c1   :  { %v95_v33 = vadd.f32 %v92_v31, %v73_v29 }
 0x1c3   :  { %98 = vst.msk [vmem:[#allocation3] sm:$0xff] %vm44_vm0, %v95_v33 }
 0x1c4   :  { %v94_v36 = vpop.xlane.xlu1 %93  ;;  %v105_v37 = vpop.xlane.xlu0 %104 }
 0x1c5   :  { %v96_v38 = vadd.f32 %v94_v36, %v74_v35  ;;  %v108_v39 = vadd.f32 %v105_v37, %v102_v34 }
 0x1c7   :  { %99 = vst.msk [vmem:[#allocation3 + $0x8] sm:$0xff] %vm44_vm0, %v96_v38  ;;  %110 = vst.msk [vmem:[#allocation4] sm:$0xff] %vm44_vm0, %v108_v39 }
 0x1c8   :  { %v107_v41 = vpop.xlane.xlu0 %106 }
 0x1c9   :  { %v109_v42 = vadd.f32 %v107_v41, %v103_v40 }
 0x1ca   :  { %v129_v44 = vld [vmem:[#allocation3] sm:$0xff] }
 0x1cb   :  { %111 = vst.msk [vmem:[#allocation4 + $0x8] sm:$0xff] %vm44_vm0, %v109_v42  ;;  %205 = vlog2.f32 %v129_v44 }
 0x1cc   :  { %v117_v45 = vpop.xlane.xlu0 %116 }
 0x1cd   :  { %v120_v46 = vadd.f32 %v117_v45, %v112_v43 }
 0x1ce   :  { %v130_v48 = vld [vmem:[#allocation3 + $0x8] sm:$0xff]  ;;  %v137_v56 = vld [vmem:[#allocation4] sm:$0xff] }
 0x1cf   :  { %122 = vst.msk [vmem:[#allocation5] sm:$0xff] %vm44_vm0, %v120_v46  ;;  %207 = vlog2.f32 %v130_v48 }
 0x1d0   :  { %v119_v49 = vpop.xlane.xlu0 %118 }
 0x1d1   :  { %v121_v50 = vadd.f32 %v119_v49, %v113_v47 }
 0x1d2   :  { %v138_v62 = vld [vmem:[#allocation4 + $0x8] sm:$0xff] }
 0x1d3   :  { %123 = vst.msk [vmem:[#allocation5 + $0x8] sm:$0xff] %vm44_vm0, %v121_v50 }
 0x1d6   :  { %v141_v60 = vld [vmem:[#allocation5] sm:$0xff] }
 0x1d8   :  { %v206_v51 = vpop.eup %205 }
 0x1d9   :  { %v132_v52 = vmul.f32 0.6931472, %v206_v51 }
 0x1da   :  { %v142_v63 = vld [vmem:[#allocation5 + $0x8] sm:$0xff] }
 0x1db   :  { %v135_v54 = vadd.f32 %v132_v52, %v127_v53 }
 0x1dc   :  { %v208_v55 = vpop.eup %207 }
 0x1dd   :  { %v134_v57 = vmul.f32 0.6931472, %v208_v55  ;;  %v139_v58 = vmul.f32 %v137_v56, %v135_v54 }
 0x1df   :  { %v136_v61 = vadd.f32 %v134_v57, %v128_v59  ;;  %v143_v1 = vsub.f32 %v139_v58, %v141_v60 }
 0x1e1   :  { %v140_v0 = vmul.f32 %v138_v62, %v136_v61  ;;  %v156_v3 = vsel %vm44_vm0, %v143_v1, 0.0 }
 0x1e3   :  { %v144_v2 = vsub.f32 %v140_v0, %v142_v63 }
 0x1e5   :  { %v157_v4 = vsel %vm44_vm0, %v144_v2, 0.0 }
 0x1e6   :  { %v158_v5 = vadd.f32 %v157_v4, %v156_v3 }
 0x1e8   :  { %159 = vadd.xlane.f32.xlu0 %v158_v5 }
 0x271   :  { %v160_v6 = vpop.xlane.xlu0 %159 }
 0x272   :  { %v161_v7 = vrot.slane %v160_v6, 4 }
 0x274   :  { %v162_v8 = vadd.f32 %v161_v7, %v160_v6 }
 0x276   :  { %v163_v9 = vrot.slane %v162_v8, 2 }
 0x278   :  { %v164_v10 = vadd.f32 %v163_v9, %v162_v8 }
 0x27a   :  { %v165_v11 = vrot.slane %v164_v10, 1 }
 0x27c   :  { %v166_v12 = vadd.f32 %v165_v11, %v164_v10 }
 0x27e   :  { %185 = vpush %v166_v12 }
 0x2af   :  { %s186_s0 = spop %185 }
 0x2b0   :  { %169 = sst [smem:[#allocation11]] %s186_s0 }
 0x2b1   :  { %177 = dma.smem_to_hbm %s270_s1, 16, %s315_s2, [#allocation8]  }
 0x2b2   :  { %261 = dma.done.wait [#allocation8], 16  }
 0x2b3   :  { %262 = vsyncadd [#allocation8], 4294967280 }
 0x2b4   :  { %181 = sfence }
 0x2b5   :  { %182 = vsyncpa [#allocation7], 1 }
 0x2b6   :  { %183 = vsyncpa [#allocation10], 1 }
 0x2b7   :  { %184 = vsyncpa [#allocation8], 1 }

</bundles_post_ra>
